<compile_context>
chip_gen: v6e
topology: v6e:2x2x1
jax: 0.10.0
libtpu: 0.0.40
codegen_flags: <defaults>
</compile_context>

<pallas_src>
import jax
import jax.numpy as jnp
from jax.experimental import pallas as pl
from jax.experimental.pallas import tpu as pltpu

INPUT_SIZE = 351
HIDDEN_SIZE = 64
OUTPUT_SIZE = 18
BN_EPS = 1e-5

# Lane/MXU-aligned padded sizes.
IN_PAD = 384      # 351 -> 3 * 128
H_PAD = 128       # 64  -> 128 (full vreg lane width)
OUT_PAD = 128     # 18  -> 128 (lane-dense output stores)
NEG_BIG = -1e30   # padded output-logit bias -> exp underflows to exactly 0


def _round_up(n, m):
    return (n + m - 1) // m * m


def _mlp_kernel(x_ref, w1_ref, w2_ref, w3_ref, b_ref, out_ref):
    # fc1 + ReLU   (dropout(p=0.5) is identity at inference time)
    h = jnp.dot(x_ref[...], w1_ref[...], preferred_element_type=jnp.float32)
    h = jnp.maximum(h + b_ref[0:1, :], 0.0)

    # fc2 + ReLU
    h = jnp.dot(h.astype(w2_ref.dtype), w2_ref[...], preferred_element_type=jnp.float32)
    h = jnp.maximum(h + b_ref[1:2, :], 0.0)

    # fc3 (eval-mode BatchNorm affine already folded into w3/b3 at param-prep time)
    logits = jnp.dot(h.astype(w3_ref.dtype), w3_ref[...], preferred_element_type=jnp.float32)
    logits = logits + b_ref[2:3, :]          # padded lanes carry -1e30

    # Numerically-stable softmax over features; padded lanes contribute exp(-1e30) == 0.
    m = jnp.max(logits, axis=1, keepdims=True)
    e = jnp.exp(logits - m)
    out_ref[...] = e * pl.reciprocal(jnp.sum(e, axis=1, keepdims=True), approx=True)


def prepare_params(p, compute_dtype=jnp.bfloat16):
    """Fold BN into fc3, zero-pad to lane-aligned shapes, cast matmul operands."""
    assert H_PAD == OUT_PAD  # biases of all three layers stack into one [3, 128] array

    # Fold eval-mode BatchNorm1d (running stats) into fc3:
    #   BN(h) = h * scale + shift  =>  fc3(BN(h)) = h @ (scale[:,None]*w3) + (b3 + shift @ w3)
    scale = p["gamma"] * jax.lax.rsqrt(p["running_var"] + BN_EPS)        # [1, H]
    shift = p["beta"] - p["running_mean"] * scale                        # [1, H]
    w3_f = scale.reshape(HIDDEN_SIZE, 1) * p["w3"]                       # [H, O]
    b3_f = p["b3"] + shift @ p["w3"]                                     # [1, O]

    # Exact zero padding (ReLU(0)=0; padded w3 rows are zero -> padded hidden lanes are inert).
    w1 = jnp.zeros((IN_PAD, H_PAD), jnp.float32).at[:INPUT_SIZE, :HIDDEN_SIZE].set(p["w1"])
    w2 = jnp.zeros((H_PAD, H_PAD), jnp.float32).at[:HIDDEN_SIZE, :HIDDEN_SIZE].set(p["w2"])
    w3 = jnp.zeros((H_PAD, OUT_PAD), jnp.float32).at[:HIDDEN_SIZE, :OUTPUT_SIZE].set(w3_f)

    b1 = jnp.zeros((H_PAD,), jnp.float32).at[:HIDDEN_SIZE].set(p["b1"][0])
    b2 = jnp.zeros((H_PAD,), jnp.float32).at[:HIDDEN_SIZE].set(p["b2"][0])
    # Huge negative bias on padded output lanes -> softmax sends them to exactly 0.
    b3 = jnp.full((OUT_PAD,), NEG_BIG, jnp.float32).at[:OUTPUT_SIZE].set(b3_f[0])
    biases = jnp.stack([b1, b2, b3], axis=0)                             # [3, 128] f32

    return dict(
        w1=w1.astype(compute_dtype),
        w2=w2.astype(compute_dtype),
        w3=w3.astype(compute_dtype),
        biases=biases,
        compute_dtype=compute_dtype,
    )


def rubiks_cube_move_predictor(x, prepped, *, tile_b=1024):
    """x: [B, INPUT_SIZE] float32. Returns softmax probs [B, OUTPUT_SIZE] float32."""
    B = x.shape[0]
    dtype = prepped["compute_dtype"]

    tb = min(tile_b, _round_up(B, 8))        # batch tile (multiple of 8 sublanes)
    B_pad = _round_up(B, tb)
    nb = B_pad // tb

    # Pad + cast once on the wrapper side (bf16 halves streamed input bytes vs f32).
    x_pad = jnp.zeros((B_pad, IN_PAD), dtype).at[:B, :INPUT_SIZE].set(x.astype(dtype))

    out = pl.pallas_call(
        _mlp_kernel,
        out_shape=jax.ShapeDtypeStruct((B_pad, OUT_PAD), jnp.float32),
        grid=(nb,),
        in_specs=[
            pl.BlockSpec((tb, IN_PAD), lambda i: (i, 0)),       # x: streamed per batch tile
            pl.BlockSpec((IN_PAD, H_PAD), lambda i: (0, 0)),    # weights: VMEM-resident
            pl.BlockSpec((H_PAD, H_PAD), lambda i: (0, 0)),
            pl.BlockSpec((H_PAD, OUT_PAD), lambda i: (0, 0)),
            pl.BlockSpec((3, H_PAD), lambda i: (0, 0)),         # stacked biases (f32)
        ],
        out_specs=pl.BlockSpec((tb, OUT_PAD), lambda i: (i, 0)),
        compiler_params=pltpu.CompilerParams(
            dimension_semantics=("parallel",)),                 # v7x: both TCs; no-op on v5e/v6e
    )(x_pad, prepped["w1"], prepped["w2"], prepped["w3"], prepped["biases"])

    return out[:B, :OUTPUT_SIZE]


def init_params(key):
    """Deterministic synthetic parameters (shapes match the PyTorch module)."""
    ks = jax.random.split(key, 8)

    def linear(kw, kb, fan_in, fan_out):
        bound = 1.0 / jnp.sqrt(fan_in)
        w = jax.random.uniform(kw, (fan_in, fan_out), jnp.float32, -bound, bound)
        b = jax.random.uniform(kb, (1, fan_out), jnp.float32, -bound, bound)
        return w, b

    w1, b1 = linear(ks[0], ks[1], INPUT_SIZE, HIDDEN_SIZE)
    w2, b2 = linear(ks[2], ks[3], HIDDEN_SIZE, HIDDEN_SIZE)
    w3, b3 = linear(ks[4], ks[5], HIDDEN_SIZE, OUTPUT_SIZE)

    # BatchNorm1d parameters / running stats (eval mode)
    gamma = jnp.ones((1, HIDDEN_SIZE), jnp.float32)
    beta = jnp.zeros((1, HIDDEN_SIZE), jnp.float32)
    running_mean = 0.1 * jax.random.normal(ks[6], (1, HIDDEN_SIZE), jnp.float32)
    running_var = 1.0 + 0.1 * jax.random.uniform(ks[7], (1, HIDDEN_SIZE), jnp.float32)

    return dict(w1=w1, b1=b1, w2=w2, b2=b2, w3=w3, b3=b3,
                gamma=gamma, beta=beta,
                running_mean=running_mean, running_var=running_var)


def _reference(x, p):
    """Pure-JAX f32 reference of the PyTorch forward (eval mode)."""
    h = jnp.maximum(x @ p["w1"] + p["b1"], 0.0)
    h = jnp.maximum(h @ p["w2"] + p["b2"], 0.0)
    h = (h - p["running_mean"]) / jnp.sqrt(p["running_var"] + BN_EPS) * p["gamma"] + p["beta"]
    logits = h @ p["w3"] + p["b3"]
    return jax.nn.softmax(logits, axis=1)


if __name__ == "__main__":
    key = jax.random.PRNGKey(0)
    k_params, k_x = jax.random.split(key)

    params = init_params(k_params)
    prepped = prepare_params(params)

    batch = 32
    x = jax.random.uniform(k_x, (batch, INPUT_SIZE), jnp.float32)  # cube-state features

    # tile_b=16 exercises the multi-tile batch grid at a small shape (default 1024 for production).
    out = rubiks_cube_move_predictor(x, prepped, tile_b=16)
    out = jax.block_until_ready(out)

    ref = _reference(x, params)
    assert out.shape == (batch, OUTPUT_SIZE)
    # bf16 matmul operands + approx reciprocal -> loosened tolerance vs the f32 reference.
    assert jnp.allclose(out, ref, atol=2e-2, rtol=0.0), float(jnp.max(jnp.abs(out - ref)))
    assert jnp.allclose(jnp.sum(out, axis=1), 1.0, atol=1e-2)

    print("KERNEL_OK")
</pallas_src>

<mosaic_0001>
module attributes {stable_mosaic.version = 11 : i64} {
  func.func @_mlp_kernel(%arg0: i32, %arg1: memref<16x384xbf16, #tpu.memory_space<vmem>>, %arg2: memref<384x128xbf16, #tpu.memory_space<vmem>>, %arg3: memref<128x128xbf16, #tpu.memory_space<vmem>>, %arg4: memref<128x128xbf16, #tpu.memory_space<vmem>>, %arg5: memref<3x128xf32, #tpu.memory_space<vmem>>, %arg6: memref<16x128xf32, #tpu.memory_space<vmem>>) attributes {dimension_semantics = [#tpu.dimension_semantics<parallel>], iteration_bounds = array<i64: 2>, scalar_prefetch = 0 : i64, scratch_operands = 0 : i64, tpu.core_type = #tpu.core_type<tc>, window_params = [{transform_indices = @transform_0, window_bounds = array<i64: 16, 384>}, {pipeline_mode = #tpu.pipeline_mode<synchronous>, transform_indices = @transform_1, window_bounds = array<i64: 384, 128>}, {pipeline_mode = #tpu.pipeline_mode<synchronous>, transform_indices = @transform_2, window_bounds = array<i64: 128, 128>}, {pipeline_mode = #tpu.pipeline_mode<synchronous>, transform_indices = @transform_3, window_bounds = array<i64: 128, 128>}, {pipeline_mode = #tpu.pipeline_mode<synchronous>, transform_indices = @transform_4, window_bounds = array<i64: 3, 128>}, {transform_indices = @transform_5, window_bounds = array<i64: 16, 128>}]} {
    %c0 = arith.constant 0 : index
    %c0_0 = arith.constant 0 : index
    %0 = vector.load %arg1[%c0, %c0_0] : memref<16x384xbf16, #tpu.memory_space<vmem>>, vector<16x384xbf16>
    %c0_1 = arith.constant 0 : index
    %c0_2 = arith.constant 0 : index
    %1 = vector.load %arg2[%c0_1, %c0_2] : memref<384x128xbf16, #tpu.memory_space<vmem>>, vector<384x128xbf16>
    %cst = arith.constant dense<0.000000e+00> : vector<16x128xf32>
    %2 = tpu.matmul %0, %1, %cst {dimension_numbers = #tpu.dot_dimension_numbers<[1], [0], [0], [1], [0, 0, 1, 1], [], []>} : vector<16x384xbf16>, vector<384x128xbf16>, vector<16x128xf32> -> vector<16x128xf32>
    %c0_3 = arith.constant 0 : index
    %c0_4 = arith.constant 0 : index
    %3 = vector.load %arg5[%c0_3, %c0_4] : memref<3x128xf32, #tpu.memory_space<vmem>>, vector<1x128xf32>
    %4 = vector.broadcast %3 : vector<1x128xf32> to vector<16x128xf32>
    %5 = arith.addf %2, %4 : vector<16x128xf32>
    %cst_5 = arith.constant 0.000000e+00 : f32
    %6 = vector.broadcast %cst_5 : f32 to vector<16x128xf32>
    %7 = arith.maximumf %5, %6 : vector<16x128xf32>
    %8 = arith.truncf %7 : vector<16x128xf32> to vector<16x128xbf16>
    %c0_6 = arith.constant 0 : index
    %c0_7 = arith.constant 0 : index
    %9 = vector.load %arg3[%c0_6, %c0_7] : memref<128x128xbf16, #tpu.memory_space<vmem>>, vector<128x128xbf16>
    %cst_8 = arith.constant dense<0.000000e+00> : vector<16x128xf32>
    %10 = tpu.matmul %8, %9, %cst_8 {dimension_numbers = #tpu.dot_dimension_numbers<[1], [0], [0], [1], [0, 0, 1, 1], [], []>} : vector<16x128xbf16>, vector<128x128xbf16>, vector<16x128xf32> -> vector<16x128xf32>
    %c1 = arith.constant 1 : index
    %c0_9 = arith.constant 0 : index
    %11 = vector.load %arg5[%c1, %c0_9] : memref<3x128xf32, #tpu.memory_space<vmem>>, vector<1x128xf32>
    %12 = vector.broadcast %11 : vector<1x128xf32> to vector<16x128xf32>
    %13 = arith.addf %10, %12 : vector<16x128xf32>
    %cst_10 = arith.constant 0.000000e+00 : f32
    %14 = vector.broadcast %cst_10 : f32 to vector<16x128xf32>
    %15 = arith.maximumf %13, %14 : vector<16x128xf32>
    %16 = arith.truncf %15 : vector<16x128xf32> to vector<16x128xbf16>
    %c0_11 = arith.constant 0 : index
    %c0_12 = arith.constant 0 : index
    %17 = vector.load %arg4[%c0_11, %c0_12] : memref<128x128xbf16, #tpu.memory_space<vmem>>, vector<128x128xbf16>
    %cst_13 = arith.constant dense<0.000000e+00> : vector<16x128xf32>
    %18 = tpu.matmul %16, %17, %cst_13 {dimension_numbers = #tpu.dot_dimension_numbers<[1], [0], [0], [1], [0, 0, 1, 1], [], []>} : vector<16x128xbf16>, vector<128x128xbf16>, vector<16x128xf32> -> vector<16x128xf32>
    %c2 = arith.constant 2 : index
    %c0_14 = arith.constant 0 : index
    %19 = vector.load %arg5[%c2, %c0_14] : memref<3x128xf32, #tpu.memory_space<vmem>>, vector<1x128xf32>
    %20 = vector.broadcast %19 : vector<1x128xf32> to vector<16x128xf32>
    %21 = arith.addf %18, %20 : vector<16x128xf32>
    %cst_15 = arith.constant dense<0xFF800000> : vector<16xf32>
    %22 = vector.multi_reduction <maximumf>, %21, %cst_15 [1] : vector<16x128xf32> to vector<16xf32>
    %23 = vector.shape_cast %22 : vector<16xf32> to vector<16x1xf32>
    %24 = vector.broadcast %23 : vector<16x1xf32> to vector<16x128xf32>
    %25 = arith.subf %21, %24 : vector<16x128xf32>
    %26 = math.exp %25 : vector<16x128xf32>
    %cst_16 = arith.constant dense<0.000000e+00> : vector<16xf32>
    %27 = vector.multi_reduction <add>, %26, %cst_16 [1] : vector<16x128xf32> to vector<16xf32>
    %28 = vector.shape_cast %27 : vector<16xf32> to vector<16x1xf32>
    %29 = tpu.reciprocal %28 {approx = true} : vector<16x1xf32> -> vector<16x1xf32>
    %30 = vector.broadcast %29 : vector<16x1xf32> to vector<16x128xf32>
    %31 = arith.mulf %26, %30 : vector<16x128xf32>
    %c0_17 = arith.constant 0 : index
    %c0_18 = arith.constant 0 : index
    %32 = vector.load %arg6[%c0_17, %c0_18] : memref<16x128xf32, #tpu.memory_space<vmem>>, vector<16x128xf32>
    tpu.vector_store %arg6[%c0_17, %c0_18], %31 {strides = array<i32>} : memref<16x128xf32, #tpu.memory_space<vmem>>, vector<16x128xf32>,
    return
  }
  func.func @transform_0(%arg0: i32) -> (i32, i32) {
    %c0_i32 = arith.constant 0 : i32
    %c0_i32_0 = arith.constant 0 : i32
    return %arg0, %c0_i32 : i32, i32
  }
  func.func @transform_1(%arg0: i32) -> (i32, i32) {
    %c0_i32 = arith.constant 0 : i32
    %c0_i32_0 = arith.constant 0 : i32
    %c0_i32_1 = arith.constant 0 : i32
    return %c0_i32, %c0_i32_0 : i32, i32
  }
  func.func @transform_2(%arg0: i32) -> (i32, i32) {
    %c0_i32 = arith.constant 0 : i32
    %c0_i32_0 = arith.constant 0 : i32
    %c0_i32_1 = arith.constant 0 : i32
    return %c0_i32, %c0_i32_0 : i32, i32
  }
  func.func @transform_3(%arg0: i32) -> (i32, i32) {
    %c0_i32 = arith.constant 0 : i32
    %c0_i32_0 = arith.constant 0 : i32
    %c0_i32_1 = arith.constant 0 : i32
    return %c0_i32, %c0_i32_0 : i32, i32
  }
  func.func @transform_4(%arg0: i32) -> (i32, i32) {
    %c0_i32 = arith.constant 0 : i32
    %c0_i32_0 = arith.constant 0 : i32
    %c0_i32_1 = arith.constant 0 : i32
    return %c0_i32, %c0_i32_0 : i32, i32
  }
  func.func @transform_5(%arg0: i32) -> (i32, i32) {
    %c0_i32 = arith.constant 0 : i32
    %c0_i32_0 = arith.constant 0 : i32
    return %arg0, %c0_i32 : i32, i32
  }
}

</mosaic_0001>

<bundles_post_ra>
// kernel: tpu_custom_call.1
= control target key start
LH: loop header
LB: loop body
LE: loop exit
PB: predicated region body
PF: predicated region fallthrough
CT: control target
= control target key end

     0   :  { %10 = vsyncpa [#allocation3], 0  ;;  %s1735_s0 = inlined_call_operand.hbm [shape: bf16[32,384], index: 0, kind: input, shape index: {}]   ;;  %s1736_s1 = inlined_call_operand.hbm [shape: bf16[384,128], index: 1, kind: input, shape index: {}]   ;;  %s1737_s2 = inlined_call_operand.hbm [shape: bf16[128,128], index: 2, kind: input, shape index: {}]   ;;  %s1738_s3 = inlined_call_operand.hbm [shape: bf16[128,128], index: 3, kind: input, shape index: {}]   ;;  %s1739_s4 = inlined_call_operand.vmem [shape: f32[3,128], index: 4, kind: input, shape index: {}]   ;;  %s1740_s5 = inlined_call_operand.hbm [shape: f32[32,128], index: 5, kind: output, shape index: {}]  }
   0x1   :  { %12 = vsyncpa [#allocation3 + $0x1], 0 }
   0x2   :  { %13 = vsyncpa [#allocation6], 0 }
   0x3   :  { %14 = vsyncpa [#allocation9], 0 }
   0x4   :  { %15 = vsyncpa [#allocation4], 0 }
   0x5   :  { %17 = vsyncpa [#allocation4 + $0x1], 0  ;;  %s1490_s18 = smov 0   ;;  %s1492_s19 = smov 0  }
   0x6   :  { %s1494_s20 = smov 0   ;;  %s1496_s21 = smov 0  }
   0x7 LB: > { %s1511_s22 = sadd.s32 4294967295, %s1445_s21   ;;  %s952_s23 = sadd.s32 4294967294, %s1445_s21   ;;  %s1445_s21 = sphi %s1496_s21, %s1764_s21   ;;  %s1441_s20 = sphi %s1494_s20, %s1763_s20   ;;  %s1437_s19 = sphi %s1492_s19, %s1762_s19   ;;  %s1433_s18 = sphi %s1490_s18, %s1761_s18  }
   0x8   : > { %p43_p0 = scmp.ne.s32.totalorder %s1437_s19, %s1433_s18  ;;  %p1741_p1 = scmp.eq.s32.totalorder %s1511_s22, 0 }
   0x9   : > { %p157_p3 = scmp.eq.s32.totalorder %s952_s23, 1  ;;  %p953_p5 = scmp.ge.s32.totalorder %s1445_s21, 1 }
   0xa   : > { %p1520_p4 = por %p1741_p1, %p43_p0  ;;  %p164_p7 = scmp.lt.s32.totalorder %s1445_s21, 3 }
   0xb   : > { %p1525_p6 = por %p157_p3, %p43_p0  ;;  %s1447_s27 = smov [#allocation5]  }
   0xc   : > { %s1745_s24 = scalar_select %p1520_p4, 1, 0 }
   0xd   : > { %s1746_s25 = scalar_select %p1525_p6, 1, 0 }
   0xe   : > { %p1530_p8 = pnand %p953_p5, %p164_p7  ;;  %s176_s28 = sshll.u32 %s1447_s27, 4  ;;  %s177_s28 = int_to_ptr.vmem [resolvable:$true] %s176_s28 }
   0xf   : > { %s1448_s30 = smov [#allocation7]   ;;  %s1449_s7 = smov [#allocation8]  }
  0x10   : > { %s1747_s26 = scalar_select %p1530_p8, 1, 0 }
  0x11   : > { %p1146_p9 = pneg %p1530_p8  ;;  %s189_s6 = sshll.u32 %s1448_s30, 4  ;;  %s190_s6 = int_to_ptr.vmem [resolvable:$true] %s189_s6 }
  0x12   : > { %s202_s8 = sshll.u32 %s1449_s7, 4  ;;  %s1278_s9 = scalar_lea.vmem %s177_s28, 3072  ;;  %s203_s8 = int_to_ptr.vmem [resolvable:$true] %s202_s8 }
  0x13   : > { %p1539_p11 = pnand %p1146_p9, %p1741_p1  ;;  %p1279_p13 = scmp.ne.s32.totalorder %s177_s28, %s1278_s9 }
  0x14   : > { %p1286_p5 = scmp.lt.s32.totalorder %s177_s28, %s177_s28  ;;  %p1287_p7 = scmp.lt.s32.totalorder %s1278_s9, %s1278_s9 }
  0x15   : > { %p1269_p12 = pneg %p1539_p11 }
  0x16   : > { %p1288_p9 = por %p1287_p7, %p1286_p5 }
  0x17   : > { %p1281_p0 = pnand %p1279_p13, %p1269_p12 }
  0x19   : > { %p1282_p3 = pneg %p1281_p0 }
  0x1b   : > { %p1289_p10 = pnand %p1288_p9, %p1282_p3 }
  0x1d   : > { %1292 = shalt.err (!%p1289_p10)
}
  0x1e   : > { %s1450_s10 = smov 64   ;;  %s1451_s11 = smov 4  }
  0x1f   : > { %1149 = dma.hbm_to_vmem [thread:$0]  (!%p1539_p11), %s1736_s1, 3072, %s177_s28, [#allocation6], %s1450_s10, %s1450_s10, %s1451_s11  }
  0x20   : > { %s1304_s14 = scalar_lea.vmem %s190_s6, 1024  ;;  %p1312_p2 = scmp.lt.s32.totalorder %s190_s6, %s190_s6 }
  0x21   : > { %p1305_p1 = scmp.ne.s32.totalorder %s190_s6, %s1304_s14  ;;  %p1313_p6 = scmp.lt.s32.totalorder %s1304_s14, %s1304_s14 }
  0x23   : > { %p1307_p13 = pnand %p1305_p1, %p1269_p12  ;;  %p1314_p5 = por %p1313_p6, %p1312_p2 }
  0x25   : > { %p1308_p0 = pneg %p1307_p13 }
  0x27   : > { %p1315_p3 = pnand %p1314_p5, %p1308_p0 }
  0x29   : > { %1318 = shalt.err (!%p1315_p3)
}
  0x2a   : > { %1152 = dma.hbm_to_vmem [thread:$0]  (!%p1539_p11), %s1737_s2, 1024, %s190_s6, [#allocation6], %s1450_s10, %s1450_s10, %s1451_s11  }
  0x2b   : > { %s1330_s17 = scalar_lea.vmem %s203_s8, 1024  ;;  %p1338_p9 = scmp.lt.s32.totalorder %s203_s8, %s203_s8 }
  0x2c   : > { %p1331_p10 = scmp.ne.s32.totalorder %s203_s8, %s1330_s17  ;;  %p1339_p13 = scmp.lt.s32.totalorder %s1330_s17, %s1330_s17 }
  0x2e   : > { %p1333_p7 = pnand %p1331_p10, %p1269_p12  ;;  %p1340_p4 = por %p1339_p13, %p1338_p9 }
  0x30   : > { %p1334_p1 = pneg %p1333_p7 }
  0x32   : > { %p1341_p2 = pnand %p1340_p4, %p1334_p1 }
  0x34   : > { %1344 = shalt.err (!%p1341_p2)
}
  0x35   : > { %1155 = dma.hbm_to_vmem [thread:$0]  (!%p1539_p11), %s1738_s3, 1024, %s203_s8, [#allocation9], %s1450_s10, %s1450_s10, %s1451_s11  }
  0x36   : > { %s1570_s28 = sadd.s32 1, %s1445_s21   ;;  %s30_s29 = sadd.s32 1, %s1441_s20 }
  0x37   : > { %s27_s30 = ssub.s32 %s1445_s21, %s1570_s28  ;;  %p37_p6 = scmp.ne.s32.totalorder %s1441_s20, %s1437_s19 }
  0x38   : > { %p28_p4 = scmp.eq.s32.totalorder %s27_s30, 0  ;;  %p38_p12 = scmp.eq.s32.totalorder %s1445_s21, 0 }
  0x39   : > { %p1167_p0 = scmp.lt.s32.totalorder %s1445_s21, 2  ;;  %p1749_p3 = scmp.eq.s32.totalorder %s1511_s22, 1 }
  0x3a   : > { %s1580_s6 = scalar_select %p28_p4, %s1441_s20, %s30_s29  }
  0x3b   : > { %p39_p5 = por %p38_p12, %p37_p6  ;;  %p1584_p10 = por %p1749_p3, %p37_p6 }
  0x3c   : > { %s219_s9 = sand.u32 1, %s1441_s20   ;;  %s1128_s12 = smul.u32 384, %s1445_s21 }
  0x3d   : > { %s1750_s7 = scalar_select %p1584_p10, 1, 0 }
  0x3e   : > { %s1127_s8 = smul.u32 24, %s219_s9  ;;  %s1593_s13 = scalar_lea.hbm %s1735_s0, %s1128_s12 }
  0x3f   : > { %p1595_p11 = pnand %p1167_p0, %p39_p5  ;;  %s1601_s17 = scalar_lea.sflag [#allocation3], %s219_s9 }
  0x40   : > { %s223_s15 = scalar_lea.vmem [#allocation2], %s1127_s8  ;;  %s1345_s23 = scalar_lea.hbm %s1593_s13, 384 }
  0x41   : > { %s231_s16 = sshll.u32 %s223_s15, 4  ;;  %p1346_p7 = scmp.ne.s32.totalorder %s1593_s13, %s1345_s23  ;;  %s1599_s16 = int_to_ptr.vmem [resolvable:$true] %s231_s16 }
  0x42   : > { %p1347_p1 = pneg %p1595_p11  ;;  %s1350_s29 = scalar_lea.hbm %s1735_s0, 768 }
  0x43   : > { %p1351_p2 = scmp.lt.s32.totalorder %s1593_s13, %s1735_s0  ;;  %p1352_p4 = scmp.lt.s32.totalorder %s1350_s29, %s1345_s23 }
  0x44   : > { %p1348_p9 = pnand %p1347_p1, %p1346_p7 }
  0x45   : > { %p1353_p6 = por %p1352_p4, %p1351_p2 }
  0x46   : > { %p1349_p13 = pneg %p1348_p9 }
  0x48   : > { %p1354_p12 = pnand %p1353_p6, %p1349_p13 }
  0x4a   : > { %1357 = shalt.err (!%p1354_p12)
}
  0x4b   : > { %s1358_s9 = scalar_lea.vmem %s1599_s16, 384  ;;  %s1452_s8 = smov [#allocation2]  }
  0x4c   : > { %p1359_p0 = scmp.ne.s32.totalorder %s1599_s16, %s1358_s9  ;;  %s1363_s11 = sshll.u32 %s1452_s8, 4  ;;  %s1364_s11 = int_to_ptr.vmem [resolvable:$false] %s1363_s11 }
  0x4d   : > { %s1365_s15 = scalar_lea.vmem %s1364_s11, 768  ;;  %p1366_p7 = scmp.lt.s32.totalorder %s1599_s16, %s1364_s11 }
  0x4e   : > { %p1361_p5 = pnand %p1359_p0, %p1347_p1  ;;  %p1367_p9 = scmp.lt.s32.totalorder %s1365_s15, %s1358_s9 }
  0x50   : > { %p1362_p3 = pneg %p1361_p5  ;;  %p1368_p10 = por %p1367_p9, %p1366_p7 }
  0x52   : > { %p1369_p8 = pnand %p1368_p10, %p1362_p3 }
  0x54   : > { %1372 = shalt.err (!%p1369_p8)
}
  0x55   : > { %s1453_s23 = smov 192   ;;  %s1454_s27 = smov 12  }
  0x56   : > { %1159 = dma.hbm_to_vmem [thread:$0]  (!%p1595_p11), %s1593_s13, 384, %s1599_s16, %s1601_s17, %s1453_s23, %s1453_s23, %s1454_s27  }
  0x57   : > { %p1752_p1 = scmp.ne.s32.totalorder %s1747_s26, 0 }
  0x58   : > { %s1625_s30 = sand.u32 (!%p1752_p1), 1, %s1437_s19   ;;  %p1753_p8 = scmp.ne.s32.totalorder (!%p1752_p1), %s1745_s24, 0 }
  0x59   : > { %243 = sbr.rel (%p1752_p1) target bundleno = 1070 (0x42e), region = 40  ;;  %s246_s12 = scalar_lea.sflag (!%p1752_p1), [#allocation3], %s1625_s30 }
  0x5a   : > { %s1129_s29 = smul.u32 (!%p1752_p1), 24, %s1625_s30 }
  0x5c   : > { %s1629_s10 = scalar_lea.vmem (!%p1752_p1), [#allocation2], %s1129_s29 }
  0x5e   : > { %1416 = dma.done.wait (%p1753_p8), %s246_s12, 384  }
  0x5f   : > { %1418 = vsyncadd (%p1753_p8), %s246_s12, 4294966912  ;;  %p1754_p10 = scmp.eq.s32.totalorder %s1511_s22, 0 }
  0x61   : > { %1420 = dma.done.wait (%p1754_p10), [#allocation6], 4096   ;;  %p1755_p11 = pmov %p1754_p10 }
  0x62   : > { %p1756_p13 = pmov %p1754_p10 }
  0x63   : > { %1422 = vsyncadd (%p1755_p11), [#allocation6], 4294963200 }
  0x64   : > { %1424 = dma.done.wait (%p1756_p13), [#allocation9], 1024   ;;  %p1757_p2 = pmov %p1754_p10 }
  0x65   : > { %v1455_v0 = vmov 0.0   ;;  %vm1456_vm0 = vmmov 0   ;;  %v1215_v1 = vld [vmem:[#allocation5 + $0x78] sm:$0xff]   ;;  %v1218_v4 = vld [vmem:[#allocation5 + $0x70] sm:$0xff]   ;;  %v1221_v7 = vld [vmem:[#allocation5 + $0x68] sm:$0xff]   ;;  %s965_s9 = sshll.u32 %s1625_s30, 4 }
  0x66   : > { %1426 = vsyncadd (%p1757_p2), [#allocation9], 4294966272  ;;  %1067 = vmatprep.subr.bf16.mxu1 %v1455_v0  ;;  %1083 = vmatprep.mubr.msk.bf16.mxu1 %vm1456_vm0, %v1455_v0  ;;  %v1216_v2 = vld [vmem:[#allocation5 + $0x38] sm:$0xff]   ;;  %v1219_v5 = vld [vmem:[#allocation5 + $0x30] sm:$0xff]   ;;  %s1017_s8 = sshll.u32 %s1511_s22, 8  ;;  %s287_s11 = scalar_lea.vmem [#allocation10], %s965_s9 }
  0x67   : > { %1018 = vmatprep.subr.bf16.mxu0 %v1215_v1  ;;  %v1217_v3 = vld [vmem:[#allocation5 + $0xb8] sm:$0xff]   ;;  %v1220_v6 = vld [vmem:[#allocation5 + $0xb0] sm:$0xff]   ;;  %v1222_v8 = vld [vmem:[#allocation5 + $0x28] sm:$0xff]   ;;  %s850_s15 = sshll.u32 %s287_s11, 4  ;;  %s1690_s29 = scalar_lea.hbm %s1740_s5, %s1017_s8  ;;  %s1692_s15 = int_to_ptr.vmem [resolvable:$true] %s850_s15 }
  0x68   : > { %1019 = vmatpush3.bf16.msra.mxu0 %v1216_v2  ;;  %1068 = vmatpush3.bf16.msra.mxu1 %v1217_v3  ;;  %v1223_v9 = vld [vmem:[#allocation5 + $0xa8] sm:$0xff]   ;;  %v1224_v10 = vld [vmem:[#allocation5 + $0x60] sm:$0xff]   ;;  %v1227_v13 = vld [vmem:[#allocation5 + $0x58] sm:$0xff]   ;;  %s837_s12 = scalar_lea.sflag [#allocation4], %s1625_s30  ;;  %p1758_p6 = scmp.ne.s32.totalorder %s1750_s7, 0 }
  0x69   : > { %1020 = vmatprep.subr.bf16.mxu0 %v1218_v4  ;;  %1069 = vmatprep.subr.bf16.mxu1 %v1455_v0  ;;  %v1225_v11 = vld [vmem:[#allocation5 + $0x20] sm:$0xff]   ;;  %v1228_v14 = vld [vmem:[#allocation5 + $0x18] sm:$0xff]   ;;  %v1230_v16 = vld [vmem:[#allocation5 + $0x50] sm:$0xff]   ;;  %s1457_s22 = smov [#allocation10]  }
  0x6a   : > { %v1226_v12 = vld [vmem:[#allocation5 + $0xa0] sm:$0xff]   ;;  %v1229_v15 = vld [vmem:[#allocation5 + $0x98] sm:$0xff]   ;;  %v1231_v17 = vld [vmem:[#allocation5 + $0x10] sm:$0xff]   ;;  %s1377_s24 = sshll.u32 %s1457_s22, 4  ;;  %s1378_s24 = int_to_ptr.vmem [resolvable:$false] %s1377_s24 }
  0x6b   : > { %v1232_v18 = vld [vmem:[#allocation5 + $0x90] sm:$0xff]   ;;  %v1233_v19 = vld [vmem:[#allocation5 + $0x48] sm:$0xff]   ;;  %v1236_v22 = vld [vmem:[#allocation5 + $0x40] sm:$0xff]   ;;  %s1379_s26 = scalar_lea.vmem %s1378_s24, 512  ;;  %p1380_p5 = scmp.lt.s32.totalorder %s1692_s15, %s1378_s24 }
  0x6c   : > { %1021 = vmatpush3.bf16.msra.mxu0 %v1219_v5  ;;  %1070 = vmatpush3.bf16.msra.mxu1 %v1220_v6  ;;  %v1234_v20 = vld [vmem:[#allocation5 + $0x8] sm:$0xff]   ;;  %v1237_v24 = vld [vmem:[#allocation5] sm:$0xff]   ;;  %v1243_v28 = vld [vmem:[#allocation7 + $0x38] sm:$0xff]  }
  0x6d   : > { %1022 = vmatprep.subr.bf16.mxu0 %v1221_v7  ;;  %1071 = vmatprep.subr.bf16.mxu1 %v1455_v0  ;;  %v1235_v21 = vld [vmem:[#allocation5 + $0x88] sm:$0xff]   ;;  %v1238_v25 = vld [vmem:[#allocation5 + $0x80] sm:$0xff]   ;;  %v1244_v29 = vld [vmem:[#allocation7 + $0x30] sm:$0xff]  }
  0x6e   : > { %v1241_v23 = vld [vmem:[%s1629_s10 + $0x4] ss:$12 sps:$4 sm:$0xff]   ;;  %v1239_v26 = vld [vmem:[%s1629_s10] ss:$12 sps:$4 sm:$0xff]   ;;  %v1242_v27 = vld [vmem:[%s1629_s10 + $0x8] ss:$12 sps:$4 sm:$0xff]  }
  0x6f   : > { %540 = vmatprep.mubr.bf16.mxu0 %v1241_v23  ;;  %v1245_v30 = vld [vmem:[#allocation7 + $0x28] sm:$0xff]   ;;  %v1246_v31 = vld [vmem:[#allocation7 + $0x20] sm:$0xff]   ;;  %v1247_v32 = vld [vmem:[#allocation7 + $0x18] sm:$0xff]   ;;  %s1373_s10 = scalar_lea.vmem %s1692_s15, 256 }
  0x70   : > { %1023 = vmatpush3.bf16.msra.mxu0 %v1222_v8  ;;  %1072 = vmatpush3.bf16.msra.mxu1 %v1223_v9  ;;  %v1248_v33 = vld [vmem:[#allocation7 + $0x10] sm:$0xff]   ;;  %v1249_v34 = vld [vmem:[#allocation7 + $0x8] sm:$0xff]   ;;  %v1250_v35 = vld [vmem:[#allocation7] sm:$0xff]   ;;  %p1374_p4 = scmp.ne.s32.totalorder %s1692_s15, %s1373_s10  ;;  %p1381_p3 = scmp.lt.s32.totalorder %s1379_s26, %s1373_s10 }
  0x71   : > { %1024 = vmatprep.subr.bf16.mxu0 %v1224_v10  ;;  %1073 = vmatprep.subr.bf16.mxu1 %v1455_v0  ;;  %v1251_v36 = vld [vmem:[#allocation8 + $0x38] sm:$0xff]   ;;  %v1252_v37 = vld [vmem:[#allocation8 + $0x30] sm:$0xff]   ;;  %v1253_v38 = vld [vmem:[#allocation8 + $0x28] sm:$0xff]  }
  0x72   : > { %v1254_v39 = vld [vmem:[#allocation8 + $0x20] sm:$0xff]   ;;  %v1255_v40 = vld [vmem:[#allocation8 + $0x18] sm:$0xff]   ;;  %v966_v43 = vld [vmem:[%s1739_s4] ss:$0 sm:$0xff]  ;;  %p1375_p12 = pnand %p1374_p4, %p1758_p6  ;;  %p1382_p7 = por %p1381_p3, %p1380_p5 }
  0x73   : > { %v1256_v59 = vld [vmem:[#allocation8 + $0x10] sm:$0xff]   ;;  %v1257_v60 = vld [vmem:[#allocation8 + $0x8] sm:$0xff]   ;;  %v1258_v61 = vld [vmem:[#allocation8] sm:$0xff]  }
  0x74   : > { %1025 = vmatpush3.bf16.msra.mxu0 %v1225_v11  ;;  %1074 = vmatpush3.bf16.msra.mxu1 %v1226_v12  ;;  %v994_v62 = vld [vmem:[%s1739_s4 + $0x1] ss:$0 sm:$0xff]  ;;  %p1376_p0 = pneg %p1375_p12 }
  0x75   : > { %1026 = vmatprep.subr.bf16.mxu0 %v1227_v13  ;;  %1075 = vmatprep.subr.bf16.mxu1 %v1455_v0 }
  0x76   : > { %p1383_p9 = pnand %p1382_p7, %p1376_p0 }
  0x78   : > { %1027 = vmatpush3.bf16.msra.mxu0 %v1228_v14  ;;  %1076 = vmatpush3.bf16.msra.mxu1 %v1229_v15 }
  0x79   : > { %1028 = vmatprep.subr.bf16.mxu0 %v1230_v16  ;;  %1077 = vmatprep.subr.bf16.mxu1 %v1455_v0 }
  0x7c   : > { %1029 = vmatpush3.bf16.msra.mxu0 %v1231_v17  ;;  %1078 = vmatpush3.bf16.msra.mxu1 %v1232_v18 }
  0x7d   : > { %1030 = vmatprep.subr.bf16.mxu0 %v1233_v19  ;;  %1079 = vmatprep.subr.bf16.mxu1 %v1455_v0 }
  0x80   : > { %1031 = vmatpush3.bf16.msra.mxu0 %v1234_v20  ;;  %1080 = vmatpush3.bf16.msra.mxu1 %v1235_v21 }
  0x81   : > { %1032 = vmatprep.subr.bf16.mxu0 %v1236_v22  ;;  %1081 = vmatprep.subr.bf16.mxu1 %v1455_v0 }
  0x84   : > { %1033 = vmatpush3.bf16.msra.mxu0 %v1237_v24  ;;  %1082 = vmatpush3.bf16.msra.mxu1 %v1238_v25 }
  0x85   : > { %1087 = vmatprep.subr.bf16.mxu0 %v1455_v0  ;;  %1107 = vmatprep.subr.bf16.mxu1 %v1455_v0 }
  0x87   : > { %541 = vmatmul.mubr.bf16.vlgmr.msra.gmra.mxu0 %v1239_v26  ;;  %1084 = vmatmul.mubr.bf16.vlgmr.msra.gmra.mxu1 %v1242_v27 }
  0x88   : > { %1088 = vmatpush3.bf16.msra.mxu0 %v1243_v28  ;;  %1103 = vmatprep.mubr.msk.bf16.mxu0 %vm1456_vm0, %v1455_v0 }
  0x89   : > { %1089 = vmatprep.subr.bf16.mxu0 %v1455_v0  ;;  %1123 = vmatprep.mubr.msk.bf16.mxu1 %vm1456_vm0, %v1455_v0 }
  0x8a   : > { %1108 = vmatpush3.bf16.msra.mxu1 %v1251_v36 }
  0x8b   : > { %1109 = vmatprep.subr.bf16.mxu1 %v1455_v0 }
  0x8c   : > { %1090 = vmatpush3.bf16.msra.mxu0 %v1244_v29 }
  0x8d   : > { %1091 = vmatprep.subr.bf16.mxu0 %v1455_v0 }
  0x8e   : > { %1110 = vmatpush3.bf16.msra.mxu1 %v1252_v37 }
  0x8f   : > { %1111 = vmatprep.subr.bf16.mxu1 %v1455_v0 }
  0x90   : > { %1092 = vmatpush3.bf16.msra.mxu0 %v1245_v30 }
  0x91   : > { %1093 = vmatprep.subr.bf16.mxu0 %v1455_v0 }
  0x92   : > { %1112 = vmatpush3.bf16.msra.mxu1 %v1253_v38 }
  0x93   : > { %1113 = vmatprep.subr.bf16.mxu1 %v1455_v0 }
  0x94   : > { %1094 = vmatpush3.bf16.msra.mxu0 %v1246_v31 }
  0x95   : > { %1095 = vmatprep.subr.bf16.mxu0 %v1455_v0 }
  0x96   : > { %1114 = vmatpush3.bf16.msra.mxu1 %v1254_v39 }
  0x97   : > { %1115 = vmatprep.subr.bf16.mxu1 %v1455_v0 }
  0x98   : > { %1096 = vmatpush3.bf16.msra.mxu0 %v1247_v32 }
  0x99   : > { %1097 = vmatprep.subr.bf16.mxu0 %v1455_v0 }
  0x9a   : > { %1116 = vmatpush3.bf16.msra.mxu1 %v1255_v40 }
  0x9b   : > { %1117 = vmatprep.subr.bf16.mxu1 %v1455_v0 }
  0x9c   : > { %1098 = vmatpush3.bf16.msra.mxu0 %v1248_v33 }
  0x9d   : > { %1099 = vmatprep.subr.bf16.mxu0 %v1455_v0 }
  0x9e   : > { %1118 = vmatpush3.bf16.msra.mxu1 %v1256_v59 }
  0x9f   : > { %1119 = vmatprep.subr.bf16.mxu1 %v1455_v0 }
  0xa0   : > { %1100 = vmatpush3.bf16.msra.mxu0 %v1249_v34 }
  0xa1   : > { %1101 = vmatprep.subr.bf16.mxu0 %v1455_v0 }
  0xa2   : > { %1120 = vmatpush3.bf16.msra.mxu1 %v1257_v60 }
  0xa3   : > { %1121 = vmatprep.subr.bf16.mxu1 %v1455_v0  ;;  %v1003_v0 = vld [vmem:[%s1739_s4 + $0x2] ss:$0 sm:$0xff] }
  0xa4   : > { %1102 = vmatpush3.bf16.msra.mxu0 %v1250_v35 }
  0xa6   : > { %1122 = vmatpush3.bf16.msra.mxu1 %v1258_v61 }
 0x147   : > { %v1034_v41 = vpop.f32.mrf.mxu0  ;;  %v583_v42 = vpop.f32.mrf.mxu1 }
 0x149   : > { %v1035_v44 = vpop.f32.mrf.mxu0  ;;  %v1085_v46 = vpop.f32.mrf.mxu1 }
 0x14a   : > { %v1036_v45 = vadd.f32 %v1035_v44, %v1034_v41 }
 0x14b   : > { %v1037_v47 = vpop.f32.mrf.mxu0  ;;  %v586_v49 = vpop.f32.mrf.mxu1 }
 0x14c   : > { %v543_v48 = vadd.f32 %v1036_v45, %v966_v43 }
 0x14d   : > { %v1038_v50 = vpop.f32.mrf.mxu0  ;;  %v1086_v52 = vpop.f32.mrf.mxu1 }
 0x14e   : > { %v1039_v51 = vadd.f32 %v1038_v50, %v1037_v47  ;;  %v584_v53 = vadd.f32 %v583_v42, %v543_v48 }
 0x150   : > { %v546_v54 = vadd.f32 %v1039_v51, %v966_v43  ;;  %v590_v56 = vmax.f32 %v584_v53, 0.0 }
 0x152   : > { %v587_v55 = vadd.f32 %v586_v49, %v546_v54 }
 0x154   : > { %v591_v57 = vmax.f32 %v587_v55, 0.0 }
 0x156   : > { %v592_v58 = vpack.c.bf16 %v591_v57, %v590_v56 }
 0x158   : > { %1104 = vmatmul.mubr.bf16.vlgmr.msra.gmra.mxu0 %v592_v58 }
 0x218   : > { %v696_v63 = vpop.f32.mrf.mxu0 }
 0x219   : > { %v697_v2 = vadd.f32 %v994_v62, %v696_v63 }
 0x21a   : > { %v1105_v1 = vpop.f32.mrf.mxu0 }
 0x21b   : > { %v703_v6 = vmax.f32 %v697_v2, 0.0 }
 0x21c   : > { %v699_v3 = vpop.f32.mrf.mxu0 }
 0x21d   : > { %v700_v4 = vadd.f32 %v994_v62, %v699_v3 }
 0x21e   : > { %v1106_v5 = vpop.f32.mrf.mxu0 }
 0x21f   : > { %v704_v7 = vmax.f32 %v700_v4, 0.0 }
 0x221   : > { %v705_v8 = vpack.c.bf16 %v704_v7, %v703_v6 }
 0x223   : > { %1124 = vmatmul.mubr.bf16.vlgmr.msra.gmra.mxu1 %v705_v8 }
 0x2e3   : > { %v809_v9 = vpop.f32.mrf.mxu1 }
 0x2e4   : > { %v810_v10 = vadd.f32 %v1003_v0, %v809_v9 }
 0x2e5   : > { %v1125_v11 = vpop.f32.mrf.mxu1 }
 0x2e6   : > { %816 = vmax.xlane.f32.xlu0 %v810_v10 }
 0x2e7   : > { %v812_v12 = vpop.f32.mrf.mxu1 }
 0x2e8   : > { %v813_v13 = vadd.f32 %v1003_v0, %v812_v12 }
 0x2e9   : > { %v1126_v14 = vpop.f32.mrf.mxu1 }
 0x2ea   : > { %818 = vmax.xlane.f32.xlu0 %v813_v13 }
 0x36f   : > { %v817_v15 = vpop.xlane.xlu0 %816 }
 0x370   : > { %v820_v16 = vsub.f32 %v810_v10, %v817_v15 }
 0x372   : > { %v822_v17 = vmul.f32 1.442695, %v820_v16 }
 0x373   : > { %v819_v18 = vpop.xlane.xlu0 %818 }
 0x374   : > { %1259 = vpow2.f32 %v822_v17  ;;  %v821_v19 = vsub.f32 %v813_v13, %v819_v18 }
 0x376   : > { %v824_v20 = vmul.f32 1.442695, %v821_v19 }
 0x378   : > { %1261 = vpow2.f32 %v824_v20 }
 0x381   : > { %v1260_v21 = vpop.eup %1259 }
 0x382   : > { %826 = vadd.xlane.f32.xlu1 %v1260_v21 }
 0x385   : > { %v1262_v22 = vpop.eup %1261 }
 0x386   : > { %828 = vadd.xlane.f32.xlu1 %v1262_v22 }
 0x40b   : > { %v827_v23 = vpop.xlane.xlu1 %826 }
 0x40c   : > { %1263 = vrcp.f32 %v827_v23 }
 0x40f   : > { %v829_v24 = vpop.xlane.xlu1 %828 }
 0x410   : > { %1265 = vrcp.f32 %v829_v24 }
 0x419   : > { %v1264_v25 = vpop.eup %1263 }
 0x41a   : > { %v832_v26 = vmul.f32 %v1264_v25, %v1260_v21 }
 0x41c   : > { %834 = vst [vmem:[%s287_s11] sm:$0xff] %v832_v26 }
 0x41d   : > { %v1266_v27 = vpop.eup %1265 }
 0x41e   : > { %v833_v28 = vmul.f32 %v1266_v27, %v1262_v22 }
 0x420   : > { %835 = vst [vmem:[%s287_s11 + $0x8] sm:$0xff] %v833_v28 }
 0x421   : > { %1386 = shalt.err (!%p1383_p9)
}
 0x422   : > { %s1387_s13 = scalar_lea.hbm %s1690_s29, 256  ;;  %s1391_s17 = scalar_lea.hbm %s1740_s5, 512 }
 0x423   : > { %p1388_p1 = scmp.ne.s32.totalorder %s1690_s29, %s1387_s13  ;;  %p1392_p11 = scmp.lt.s32.totalorder %s1690_s29, %s1740_s5 }
 0x424   : > { %p1393_p13 = scmp.lt.s32.totalorder %s1391_s17, %s1387_s13 }
 0x425   : > { %p1389_p8 = pnand %p1388_p1, %p1758_p6 }
 0x426   : > { %p1394_p2 = por %p1393_p13, %p1392_p11 }
 0x427   : > { %p1390_p10 = pneg %p1389_p8 }
 0x429   : > { %p1395_p4 = pnand %p1394_p2, %p1390_p10 }
 0x42b   : > { %1398 = shalt.err (!%p1395_p4)
}
 0x42c   : > { %s1458_s11 = smov 128   ;;  %s1459_s23 = smov 8  }
 0x42d   : > { %1144 = dma.vmem_to_hbm [thread:$0]  (%p1758_p6), %s1692_s15, 256, %s1690_s29, %s837_s12, %s1458_s11, %s1458_s11, %s1459_s23  }
 0x42e PF: > { %s865_s27 = sand.u32 1, %s1433_s18   ;;  %p1759_p12 = scmp.ne.s32.totalorder %s1746_s25, 0 }
 0x42f   : > { %p1760_p0 = scmp.ge.s32.totalorder %s1445_s21, 2  ;;  %s866_s10 = scalar_lea.sflag [#allocation4], %s865_s27 }
 0x431   : > { %p1161_p5 = pnand %p1760_p0, %p1759_p12 }
 0x433   : > { %p1162_p3 = pneg %p1161_p5 }
 0x435   : > { %1428 = dma.done.wait (%p1162_p3), %s866_s10, 256  }
 0x436   : > { %1430 = vsyncadd (%p1162_p3), %s866_s10, 4294967040  ;;  %p20_p7 = scmp.ge.s32.totalorder %s1570_s28, 4   ;;  %s1761_s18 = smov %s1437_s19 }
 0x437   : > { %s1762_s19 = smov %s1441_s20  ;;  %s1763_s20 = smov %s1580_s6 }
 0x438   : > { %s1764_s21 = smov %s1570_s28  ;;  %22 = sbr.rel (!%p20_p7) target bundleno = 7 (0x7), region = 97 }
 0x43d   :  { %871 = vsyncpa [#allocation3], 1 }
 0x43e   :  { %873 = vsyncpa [#allocation3 + $0x1], 1 }
 0x43f   :  { %874 = vsyncpa [#allocation6], 1 }
 0x440   :  { %875 = vsyncpa [#allocation9], 1 }
 0x441   :  { %876 = vsyncpa [#allocation4], 1 }
 0x442   :  { %878 = vsyncpa [#allocation4 + $0x1], 1 }

</bundles_post_ra>
